<compile_context>
chip_gen: v5e
topology: v5e:2x2
jax: 0.10.0
libtpu: 0.0.40
codegen_flags: <defaults>
</compile_context>

<pallas_src>
import jax
import jax.numpy as jnp
from jax.experimental import pallas as pl
from jax.experimental.pallas import tpu as pltpu

# ---- static configuration (small synthetic shapes) -------------------------
N_VERT = 32          # number of hypergraph vertices
N_EDGE = 16          # number of hyperedges
IN_CH = 16           # in_channels (== out_channels so the residual add works)
HID_CH = 32          # hid_channels
OUT_CH = 16          # out_channels
NUM_HEADS = 4
D_HEAD = HID_CH // NUM_HEADS
ATTEN_NEG_SLOPE = 0.2
LN_EPS = 1e-6
LAYER_SCALE_INIT = 1e-6
SQRT_HALF = 0.7071067811865476

assert IN_CH <= HID_CH and OUT_CH <= HID_CH and IN_CH == OUT_CH

# packed incidence buffer: rows [0,N) = H (lanes [0,E)), rows [N,N+E) = H^T (lanes [0,N))
LANE_H = max(N_VERT, N_EDGE)

# row offsets inside the packed parameter buffer (lane width = HID_CH)
R_WALL = 0                       # (IN_CH, HID)  fused theta weight, all heads
R_WSCORE = R_WALL + IN_CH        # (HID, HID)    block-diag attention (pre-expanded per channel)
R_WCONV = R_WSCORE + HID_CH      # (HID, HID)    conv weight, zero-padded lanes [OUT, HID)
R_BALL = R_WCONV + HID_CH        # (1, HID)      fused theta bias
R_LNW = R_BALL + 1               # (1, HID)      LayerNorm weight
R_LNB = R_LNW + 1                # (1, HID)      LayerNorm bias
R_BC = R_LNB + 1                 # (1, HID)      conv bias (lanes [0, OUT))
R_GAMMA = R_BC + 1               # (1, HID)      layer-scale gamma (lanes [0, OUT))
P_ROWS = R_GAMMA + 1             # = 85


def _recip(x):
    """Reciprocal on the (otherwise idle) EUP slot + one Newton step (~f32 accurate)."""
    r = pl.reciprocal(x, approx=True)
    return r * (2.0 - x * r)


def attblock_kernel(x_ref, hh_ref, p_ref, o_ref):
    X = x_ref[...]                                                    # (N, Cin) f32

    # incidence matrix and its transpose from the single packed bf16 buffer
    Hf = hh_ref[0:N_VERT, 0:N_EDGE].astype(jnp.float32)               # (N, E)
    Ht = hh_ref[N_VERT:N_VERT + N_EDGE, 0:N_VERT].astype(jnp.float32)  # (E, N)

    # packed parameters: static ref slices (zero-cost views, one DMA for all of them)
    W_all = p_ref[R_WALL:R_WALL + IN_CH, :]                           # (Cin, HID)
    W_score = p_ref[R_WSCORE:R_WSCORE + HID_CH, :]                    # (HID, HID)
    Wc_pad = p_ref[R_WCONV:R_WCONV + HID_CH, :]                       # (HID, HID)
    b_all = p_ref[R_BALL:R_BALL + 1, :]                               # (1, HID)
    lnw = p_ref[R_LNW:R_LNW + 1, :]
    lnb = p_ref[R_LNB:R_LNB + 1, :]
    bc = p_ref[R_BC:R_BC + 1, 0:OUT_CH]                               # (1, OUT)
    gamma = p_ref[R_GAMMA:R_GAMMA + 1, 0:OUT_CH]                      # (1, OUT)

    # --- theta for ALL heads: one (N,Cin)@(Cin,HID) matmul (heads concatenated) ---
    Xh = jnp.dot(X, W_all, preferred_element_type=jnp.float32) + b_all  # (N, HID)

    # --- hg.v2e(mean): head-invariant, computed once on the fused activation ---
    deg_e = jnp.sum(Ht, axis=1, keepdims=True)                          # (E, 1)
    # Empty hyperedges map to zero features; they never contribute downstream.
    inv_deg = _recip(jnp.maximum(deg_e, 1.0))
    Y = jnp.dot(Ht, Xh, preferred_element_type=jnp.float32) * inv_deg   # (E, HID)

    # --- per-edge, per-head attention scores, already expanded across each head's
    #     channel slice (wa and the head->slice expansion folded into W_score) ---
    A = jnp.dot(Y, W_score, preferred_element_type=jnp.float32)         # (E, HID)
    S = jnp.where(A >= 0.0, A, ATTEN_NEG_SLOPE * A)                     # LeakyReLU(0.2)
    # Per-head global shift (valid softmax stabilizer: exp(-c) multiplies numerator
    # and denominator of every (vertex, head) group identically and cancels below).
    # NOTE: with an extreme per-head score spread (~80+) incident-edge weights could
    # underflow in f32; fine for this scale.
    c = jnp.max(S, axis=0, keepdims=True)                               # (1, HID)
    w_edge = jnp.exp(S - c)                                             # (E, HID), <= 1

    # --- hg.e2v 'softmax_then_sum' for all heads: ONE merged MXU pass ----------
    R = jnp.concatenate([w_edge * Y, w_edge], axis=-1)                  # (E, 2*HID)
    HR = jnp.dot(Hf, R, preferred_element_type=jnp.float32)             # (N, 2*HID)
    acc = HR[:, 0:HID_CH]
    den = HR[:, HID_CH:2 * HID_CH]
    Z = acc * _recip(jnp.maximum(den, 1e-30))                           # softmax-weighted sum

    # ELU (UniGATConv is_last=False path)
    Z = jnp.where(Z > 0.0, Z, jnp.exp(jnp.minimum(Z, 0.0)) - 1.0)

    # LayerNorm(hid, eps=1e-6)  (biased variance, as in torch)
    mu = jnp.mean(Z, axis=-1, keepdims=True)
    var = jnp.mean((Z - mu) * (Z - mu), axis=-1, keepdims=True)
    Zn = (Z - mu) * jax.lax.rsqrt(var + LN_EPS) * lnw + lnb

    # GELU (exact / erf, matching nn.GELU() default)
    G = 0.5 * Zn * (1.0 + jax.lax.erf(Zn * jnp.float32(SQRT_HALF)))

    # self.conv = nn.Linear(hid, out); zero-padded weight lanes give exact-zero
    # columns which the static slice drops.
    Out = jnp.dot(G, Wc_pad, preferred_element_type=jnp.float32)[:, 0:OUT_CH] + bc

    # layer-scale gamma, then residual (drop_path=0.0 -> Identity)
    o_ref[...] = X + Out * gamma


def pack_params(Wt, bt, wa, lnw, lnb, Wc, bc, gamma):
    """Fold all module parameters into ONE lane-dense (P_ROWS, HID) f32 buffer."""
    # fused theta: W_all[:, h*dh+j] = Wt[h, :, j]
    W_all = jnp.transpose(Wt, (1, 0, 2)).reshape(IN_CH, HID_CH)
    b_all = bt.reshape(1, HID_CH)
    # W_score = Wa_blockdiag @ Expand: W_score[i, c] = wa_flat[i] iff head(i)==head(c)
    head_of_ch = jnp.arange(HID_CH) // D_HEAD
    wa_flat = wa.reshape(HID_CH)
    W_score = jnp.where(head_of_ch[:, None] == head_of_ch[None, :],
                        wa_flat[:, None], 0.0).astype(jnp.float32)
    # conv weight, zero-padded on the output lanes to HID width
    Wc_pad = jnp.zeros((HID_CH, HID_CH), jnp.float32).at[:, :OUT_CH].set(Wc)

    def row(v, width):
        return jnp.zeros((1, HID_CH), jnp.float32).at[:, :width].set(
            jnp.reshape(v, (1, width)))

    pack = jnp.concatenate(
        [W_all, W_score, Wc_pad,
         row(b_all, HID_CH), row(lnw, HID_CH), row(lnb, HID_CH),
         row(bc, OUT_CH), row(gamma, OUT_CH)], axis=0).astype(jnp.float32)
    assert pack.shape == (P_ROWS, HID_CH)
    return pack


def pack_incidence(H):
    """Pack H and H^T into one bf16 buffer (0/1 exact in bf16, half the DMA bytes)."""
    Hp = jnp.zeros((N_VERT, LANE_H), jnp.float32).at[:, :N_EDGE].set(H)
    Htp = jnp.zeros((N_EDGE, LANE_H), jnp.float32).at[:, :N_VERT].set(H.T)
    return jnp.concatenate([Hp, Htp], axis=0).astype(jnp.bfloat16)


@jax.jit
def attblock_forward(X, HH, pack):
    # NOTE: grid-less single call is appropriate at these toy sizes; for real graph
    # sizes one would add a vertex-tile grid axis marked "parallel" (and re-derive
    # tile sizes for v7x's 64 MiB VMEM / v5e's 16 MiB scoped default).
    vmem = pl.BlockSpec(memory_space=pltpu.MemorySpace.VMEM)
    return pl.pallas_call(
        attblock_kernel,
        out_shape=jax.ShapeDtypeStruct((N_VERT, OUT_CH), jnp.float32),
        in_specs=[vmem, vmem, vmem],
        out_specs=vmem,
        cost_estimate=pl.CostEstimate(flops=230_000, transcendentals=4_000,
                                      bytes_accessed=20_000),
    )(X, HH, pack)


def reference_forward(X, H, Wt, bt, wa, lnw, lnb, Wc, bc, gamma):
    """Plain-jnp per-head reference (eval-mode PyTorch semantics)."""
    Ht = H.T
    deg_e = jnp.sum(Ht, axis=1, keepdims=True)
    inv_deg_e = 1.0 / jnp.maximum(deg_e, 1.0)
    mask = H > 0.0
    mask_f = mask.astype(jnp.float32)
    outs = []
    for h in range(NUM_HEADS):
        Xh = X @ Wt[h] + bt[h]
        Y = (Ht @ Xh) * inv_deg_e
        a = Y @ wa[h]
        s = jnp.where(a >= 0.0, a, ATTEN_NEG_SLOPE * a)
        scores = jnp.where(mask, s.T, -1e30)
        m = jnp.max(scores, axis=-1, keepdims=True)
        p = jnp.exp(scores - m) * mask_f
        p = p / jnp.maximum(jnp.sum(p, axis=-1, keepdims=True), 1e-30)
        Oh = p @ Y
        Oh = jnp.where(Oh > 0.0, Oh, jnp.exp(jnp.minimum(Oh, 0.0)) - 1.0)
        outs.append(Oh)
    Z = jnp.concatenate(outs, axis=-1)
    mu = jnp.mean(Z, axis=-1, keepdims=True)
    var = jnp.mean((Z - mu) ** 2, axis=-1, keepdims=True)
    Zn = (Z - mu) / jnp.sqrt(var + LN_EPS) * lnw + lnb
    G = 0.5 * Zn * (1.0 + jax.lax.erf(Zn * SQRT_HALF))
    Out = G @ Wc + bc
    return X + Out * gamma


def make_params(key):
    ks = jax.random.split(key, 6)
    Wt = 0.1 * jax.random.normal(ks[0], (NUM_HEADS, IN_CH, D_HEAD), jnp.float32)
    bt = 0.01 * jax.random.normal(ks[1], (NUM_HEADS, 1, D_HEAD), jnp.float32)
    wa = 0.1 * jax.random.normal(ks[2], (NUM_HEADS, D_HEAD, 1), jnp.float32)
    lnw = jnp.ones((1, HID_CH), jnp.float32)
    lnb = jnp.zeros((1, HID_CH), jnp.float32)
    Wc = 0.1 * jax.random.normal(ks[3], (HID_CH, OUT_CH), jnp.float32)
    bc = 0.01 * jax.random.normal(ks[4], (1, OUT_CH), jnp.float32)
    gamma = LAYER_SCALE_INIT * jnp.ones((1, OUT_CH), jnp.float32)
    return Wt, bt, wa, lnw, lnb, Wc, bc, gamma


def make_inputs(key):
    kx, kh = jax.random.split(key)
    X = jax.random.normal(kx, (N_VERT, IN_CH), jnp.float32)
    H = (jax.random.uniform(kh, (N_VERT, N_EDGE)) < 0.3).astype(jnp.float32)
    rows = jnp.arange(N_VERT)
    H = H.at[rows, rows % N_EDGE].set(1.0)   # every vertex in >= 1 hyperedge
    return X, H


if __name__ == "__main__":
    key = jax.random.PRNGKey(0)
    kp, ki = jax.random.split(key)
    params = make_params(kp)
    X, H = make_inputs(ki)
    # TODO(synk): nn.Dropout / DropPath are stochastic train-time ops; eval-mode
    # (identity) semantics are implemented here.
    pack = pack_params(*params)          # one-time parameter packing
    HH = pack_incidence(H)               # incidence + transpose, one bf16 buffer
    out = attblock_forward(X, HH, pack)
    jax.block_until_ready(out)
    ref = reference_forward(X, H, *params)
    assert out.shape == (N_VERT, OUT_CH) and out.dtype == jnp.float32
    assert not bool(jnp.any(jnp.isnan(out)))
    err = float(jnp.max(jnp.abs(out - ref)))
    assert bool(jnp.allclose(out, ref, rtol=1e-4, atol=1e-5)), err
    print("KERNEL_OK")
</pallas_src>

<mosaic_0001>
module attributes {stable_mosaic.version = 11 : i64} {
  func.func @attblock_kernel(%arg0: memref<32x16xf32, #tpu.memory_space<vmem>>, %arg1: memref<48x32xbf16, #tpu.memory_space<vmem>>, %arg2: memref<85x32xf32, #tpu.memory_space<vmem>>, %arg3: memref<32x16xf32, #tpu.memory_space<vmem>>) attributes {dimension_semantics = [], scalar_prefetch = 0 : i64, scratch_operands = 0 : i64, tpu.core_type = #tpu.core_type<tc>} {
    %c0 = arith.constant 0 : index
    %c0_0 = arith.constant 0 : index
    %0 = vector.load %arg0[%c0, %c0_0] : memref<32x16xf32, #tpu.memory_space<vmem>>, vector<32x16xf32>
    %c0_1 = arith.constant 0 : index
    %c0_2 = arith.constant 0 : index
    %1 = vector.load %arg1[%c0_1, %c0_2] : memref<48x32xbf16, #tpu.memory_space<vmem>>, vector<32x16xbf16>
    %2 = arith.extf %1 : vector<32x16xbf16> to vector<32x16xf32>
    %c32 = arith.constant 32 : index
    %c0_3 = arith.constant 0 : index
    %3 = vector.load %arg1[%c32, %c0_3] : memref<48x32xbf16, #tpu.memory_space<vmem>>, vector<16x32xbf16>
    %4 = arith.extf %3 : vector<16x32xbf16> to vector<16x32xf32>
    %c0_4 = arith.constant 0 : index
    %c0_5 = arith.constant 0 : index
    %5 = vector.load %arg2[%c0_4, %c0_5] : memref<85x32xf32, #tpu.memory_space<vmem>>, vector<16x32xf32>
    %c16 = arith.constant 16 : index
    %c0_6 = arith.constant 0 : index
    %6 = vector.load %arg2[%c16, %c0_6] : memref<85x32xf32, #tpu.memory_space<vmem>>, vector<32x32xf32>
    %c48 = arith.constant 48 : index
    %c0_7 = arith.constant 0 : index
    %7 = vector.load %arg2[%c48, %c0_7] : memref<85x32xf32, #tpu.memory_space<vmem>>, vector<32x32xf32>
    %c80 = arith.constant 80 : index
    %c0_8 = arith.constant 0 : index
    %8 = vector.load %arg2[%c80, %c0_8] : memref<85x32xf32, #tpu.memory_space<vmem>>, vector<1x32xf32>
    %c81 = arith.constant 81 : index
    %c0_9 = arith.constant 0 : index
    %9 = vector.load %arg2[%c81, %c0_9] : memref<85x32xf32, #tpu.memory_space<vmem>>, vector<1x32xf32>
    %c82 = arith.constant 82 : index
    %c0_10 = arith.constant 0 : index
    %10 = vector.load %arg2[%c82, %c0_10] : memref<85x32xf32, #tpu.memory_space<vmem>>, vector<1x32xf32>
    %c83 = arith.constant 83 : index
    %c0_11 = arith.constant 0 : index
    %11 = vector.load %arg2[%c83, %c0_11] : memref<85x32xf32, #tpu.memory_space<vmem>>, vector<1x16xf32>
    %c84 = arith.constant 84 : index
    %c0_12 = arith.constant 0 : index
    %12 = vector.load %arg2[%c84, %c0_12] : memref<85x32xf32, #tpu.memory_space<vmem>>, vector<1x16xf32>
    %cst = arith.constant dense<0.000000e+00> : vector<32x32xf32>
    %13 = tpu.matmul %0, %5, %cst {dimension_numbers = #tpu.dot_dimension_numbers<[1], [0], [0], [1], [0, 0, 1, 1], [], []>} : vector<32x16xf32>, vector<16x32xf32>, vector<32x32xf32> -> vector<32x32xf32>
    %14 = vector.broadcast %8 : vector<1x32xf32> to vector<32x32xf32>
    %15 = arith.addf %13, %14 : vector<32x32xf32>
    %cst_13 = arith.constant dense<0.000000e+00> : vector<16xf32>
    %16 = vector.multi_reduction <add>, %4, %cst_13 [1] : vector<16x32xf32> to vector<16xf32>
    %17 = vector.shape_cast %16 : vector<16xf32> to vector<16x1xf32>
    %cst_14 = arith.constant 1.000000e+00 : f32
    %18 = vector.broadcast %cst_14 : f32 to vector<16x1xf32>
    %19 = arith.maximumf %17, %18 : vector<16x1xf32>
    %20 = tpu.reciprocal %19 {approx = true} : vector<16x1xf32> -> vector<16x1xf32>
    %21 = arith.mulf %19, %20 : vector<16x1xf32>
    %cst_15 = arith.constant 2.000000e+00 : f32
    %22 = vector.broadcast %cst_15 : f32 to vector<16x1xf32>
    %23 = arith.subf %22, %21 : vector<16x1xf32>
    %24 = arith.mulf %20, %23 : vector<16x1xf32>
    %cst_16 = arith.constant dense<0.000000e+00> : vector<16x32xf32>
    %25 = tpu.matmul %4, %15, %cst_16 {dimension_numbers = #tpu.dot_dimension_numbers<[1], [0], [0], [1], [0, 0, 1, 1], [], []>} : vector<16x32xf32>, vector<32x32xf32>, vector<16x32xf32> -> vector<16x32xf32>
    %26 = vector.broadcast %24 : vector<16x1xf32> to vector<16x32xf32>
    %27 = arith.mulf %25, %26 : vector<16x32xf32>
    %cst_17 = arith.constant dense<0.000000e+00> : vector<16x32xf32>
    %28 = tpu.matmul %27, %6, %cst_17 {dimension_numbers = #tpu.dot_dimension_numbers<[1], [0], [0], [1], [0, 0, 1, 1], [], []>} : vector<16x32xf32>, vector<32x32xf32>, vector<16x32xf32> -> vector<16x32xf32>
    %cst_18 = arith.constant 0.000000e+00 : f32
    %29 = vector.broadcast %cst_18 : f32 to vector<16x32xf32>
    %30 = arith.cmpf oge, %28, %29 : vector<16x32xf32>
    %cst_19 = arith.constant 2.000000e-01 : f32
    %31 = vector.broadcast %cst_19 : f32 to vector<16x32xf32>
    %32 = arith.mulf %31, %28 : vector<16x32xf32>
    %33 = arith.select %30, %28, %32 : vector<16x32xi1>, vector<16x32xf32>
    %cst_20 = arith.constant dense<0xFF800000> : vector<32xf32>
    %34 = vector.multi_reduction <maximumf>, %33, %cst_20 [0] : vector<16x32xf32> to vector<32xf32>
    %35 = vector.shape_cast %34 : vector<32xf32> to vector<1x32xf32>
    %36 = vector.broadcast %35 : vector<1x32xf32> to vector<16x32xf32>
    %37 = arith.subf %33, %36 : vector<16x32xf32>
    %38 = math.exp %37 : vector<16x32xf32>
    %39 = arith.mulf %38, %27 : vector<16x32xf32>
    %40 = tpu.concatenate %39, %38 in 1 : vector<16x32xf32>, vector<16x32xf32> -> vector<16x64xf32>
    %cst_21 = arith.constant dense<0.000000e+00> : vector<32x64xf32>
    %41 = tpu.matmul %2, %40, %cst_21 {dimension_numbers = #tpu.dot_dimension_numbers<[1], [0], [0], [1], [0, 0, 1, 1], [], []>} : vector<32x16xf32>, vector<16x64xf32>, vector<32x64xf32> -> vector<32x64xf32>
    %42 = vector.extract_strided_slice %41 {offsets = [0, 0], sizes = [32, 32], strides = [1, 1]} : vector<32x64xf32> to vector<32x32xf32>
    %43 = vector.extract_strided_slice %41 {offsets = [0, 32], sizes = [32, 32], strides = [1, 1]} : vector<32x64xf32> to vector<32x32xf32>
    %cst_22 = arith.constant 1.000000e-30 : f32
    %44 = vector.broadcast %cst_22 : f32 to vector<32x32xf32>
    %45 = arith.maximumf %43, %44 : vector<32x32xf32>
    %46 = tpu.reciprocal %45 {approx = true} : vector<32x32xf32> -> vector<32x32xf32>
    %47 = arith.mulf %45, %46 : vector<32x32xf32>
    %cst_23 = arith.constant 2.000000e+00 : f32
    %48 = vector.broadcast %cst_23 : f32 to vector<32x32xf32>
    %49 = arith.subf %48, %47 : vector<32x32xf32>
    %50 = arith.mulf %46, %49 : vector<32x32xf32>
    %51 = arith.mulf %42, %50 : vector<32x32xf32>
    %cst_24 = arith.constant 0.000000e+00 : f32
    %52 = vector.broadcast %cst_24 : f32 to vector<32x32xf32>
    %53 = arith.cmpf ogt, %51, %52 : vector<32x32xf32>
    %cst_25 = arith.constant 0.000000e+00 : f32
    %54 = vector.broadcast %cst_25 : f32 to vector<32x32xf32>
    %55 = arith.minimumf %51, %54 : vector<32x32xf32>
    %56 = math.exp %55 : vector<32x32xf32>
    %cst_26 = arith.constant 1.000000e+00 : f32
    %57 = vector.broadcast %cst_26 : f32 to vector<32x32xf32>
    %58 = arith.subf %56, %57 : vector<32x32xf32>
    %59 = arith.select %53, %51, %58 : vector<32x32xi1>, vector<32x32xf32>
    %cst_27 = arith.constant dense<0.000000e+00> : vector<32xf32>
    %60 = vector.multi_reduction <add>, %59, %cst_27 [1] : vector<32x32xf32> to vector<32xf32>
    %61 = vector.shape_cast %60 : vector<32xf32> to vector<32x1xf32>
    %cst_28 = arith.constant 3.200000e+01 : f32
    %62 = vector.broadcast %cst_28 : f32 to vector<32x1xf32>
    %63 = arith.divf %61, %62 : vector<32x1xf32>
    %64 = vector.broadcast %63 : vector<32x1xf32> to vector<32x32xf32>
    %65 = arith.subf %59, %64 : vector<32x32xf32>
    %66 = vector.broadcast %63 : vector<32x1xf32> to vector<32x32xf32>
    %67 = arith.subf %59, %66 : vector<32x32xf32>
    %68 = arith.mulf %65, %67 : vector<32x32xf32>
    %cst_29 = arith.constant dense<0.000000e+00> : vector<32xf32>
    %69 = vector.multi_reduction <add>, %68, %cst_29 [1] : vector<32x32xf32> to vector<32xf32>
    %70 = vector.shape_cast %69 : vector<32xf32> to vector<32x1xf32>
    %cst_30 = arith.constant 3.200000e+01 : f32
    %71 = vector.broadcast %cst_30 : f32 to vector<32x1xf32>
    %72 = arith.divf %70, %71 : vector<32x1xf32>
    %73 = vector.broadcast %63 : vector<32x1xf32> to vector<32x32xf32>
    %74 = arith.subf %59, %73 : vector<32x32xf32>
    %cst_31 = arith.constant 9.99999997E-7 : f32
    %75 = vector.broadcast %cst_31 : f32 to vector<32x1xf32>
    %76 = arith.addf %72, %75 : vector<32x1xf32>
    %77 = math.rsqrt %76 : vector<32x1xf32>
    %78 = vector.broadcast %77 : vector<32x1xf32> to vector<32x32xf32>
    %79 = arith.mulf %74, %78 : vector<32x32xf32>
    %80 = vector.broadcast %9 : vector<1x32xf32> to vector<32x32xf32>
    %81 = arith.mulf %79, %80 : vector<32x32xf32>
    %82 = vector.broadcast %10 : vector<1x32xf32> to vector<32x32xf32>
    %83 = arith.addf %81, %82 : vector<32x32xf32>
    %cst_32 = arith.constant 5.000000e-01 : f32
    %84 = vector.broadcast %cst_32 : f32 to vector<32x32xf32>
    %85 = arith.mulf %84, %83 : vector<32x32xf32>
    %cst_33 = arith.constant 0.707106769 : f32
    %86 = vector.broadcast %cst_33 : f32 to vector<32x32xf32>
    %87 = arith.mulf %83, %86 : vector<32x32xf32>
    %88 = math.erf %87 : vector<32x32xf32>
    %cst_34 = arith.constant 1.000000e+00 : f32
    %89 = vector.broadcast %cst_34 : f32 to vector<32x32xf32>
    %90 = arith.addf %89, %88 : vector<32x32xf32>
    %91 = arith.mulf %85, %90 : vector<32x32xf32>
    %cst_35 = arith.constant dense<0.000000e+00> : vector<32x32xf32>
    %92 = tpu.matmul %91, %7, %cst_35 {dimension_numbers = #tpu.dot_dimension_numbers<[1], [0], [0], [1], [0, 0, 1, 1], [], []>} : vector<32x32xf32>, vector<32x32xf32>, vector<32x32xf32> -> vector<32x32xf32>
    %93 = vector.extract_strided_slice %92 {offsets = [0, 0], sizes = [32, 16], strides = [1, 1]} : vector<32x32xf32> to vector<32x16xf32>
    %94 = vector.broadcast %11 : vector<1x16xf32> to vector<32x16xf32>
    %95 = arith.addf %93, %94 : vector<32x16xf32>
    %96 = vector.broadcast %12 : vector<1x16xf32> to vector<32x16xf32>
    %97 = arith.mulf %95, %96 : vector<32x16xf32>
    %98 = arith.addf %0, %97 : vector<32x16xf32>
    %c0_36 = arith.constant 0 : index
    %c0_37 = arith.constant 0 : index
    %99 = vector.load %arg3[%c0_36, %c0_37] : memref<32x16xf32, #tpu.memory_space<vmem>>, vector<32x16xf32>
    tpu.vector_store %arg3[%c0_36, %c0_37], %98 {strides = array<i32>} : memref<32x16xf32, #tpu.memory_space<vmem>>, vector<32x16xf32>,
    return
  }
}

</mosaic_0001>

<bundles_post_ra>
// kernel: attblock_forward.1
= control target key start
LH: loop header
LB: loop body
LE: loop exit
PB: predicated region body
PF: predicated region fallthrough
CT: control target
= control target key end

     0   :  { %vm46_vm0 = vcmask 130048   ;;  %vm88_vm1 = vcmask 261120   ;;  %s740_s8 = smov 32   ;;  %s741_s13 = smov 96   ;;  %s1036_s2 = inlined_call_operand.vmem [shape: f32[85,32], index: 2, kind: input, shape index: {}]   ;;  %s1037_s0 = inlined_call_operand.vmem [shape: f32[32,16], index: 0, kind: input, shape index: {}]   ;;  %s1038_s1 = inlined_call_operand.vmem [shape: bf16[48,32], index: 1, kind: input, shape index: {}]   ;;  %s1039_s3 = inlined_call_operand.vmem [shape: f32[32,16], index: 3, kind: output, shape index: {}]  }
   0x1   :  { %v31_v0 = vld [vmem:[%s1036_s2 + $0x8] sm:$0xff]  ;;  %v30_v1 = vld [vmem:[%s1036_s2] sm:$0xff]  ;;  %v786_v4 = vld [vmem:[%s1037_s0 + $0x10] sm:$0xff] }
   0x2   :  { %73 = vmatpush.msra.mxu0 %v31_v0  ;;  %v772_v2 = vld [vmem:[%s1037_s0] sm:$0xff]  ;;  %v779_v3 = vld [vmem:[%s1037_s0 + $0x8] sm:$0xff]  ;;  %v793_v5 = vld [vmem:[%s1037_s0 + $0x18] sm:$0xff] }
   0x3   :  { %v684_v6 = vld [vmem:[%s1038_s1 + $0x10] sm:$0xff]   ;;  %v35_v20 = vld [vmem:[%s1036_s2 + $0x28] sm:$0xff]  ;;  %v34_v21 = vld [vmem:[%s1036_s2 + $0x20] sm:$0xff] }
   0x4   :  { %74 = vmatpush.msra.mxu0 %v30_v1  ;;  %v681_v7 = vunpack.c.l.bf16 %v684_v6  ;;  %v682_v10 = vunpack.c.h.bf16 %v684_v6  ;;  %v693_v14 = vld [vmem:[%s1036_s2 + $0x50] ss:$0 sm:$0xff]  ;;  %v33_v22 = vld [vmem:[%s1036_s2 + $0x18] sm:$0xff]  ;;  %v672_v63 = vld [vmem:[%s1038_s1] sm:$0xff]  }
   0x5   :  { %647 = vmatmul.msk.f32.vlgmr.msra.gmra.mxu0 %vm46_vm0, %v772_v2  ;;  %v32_v23 = vld [vmem:[%s1036_s2 + $0x10] sm:$0xff] }
   0x6   :  { %v89_v8 = vsel %vm88_vm1, %v681_v7, 0.0  ;;  %v92_v11 = vsel %vm88_vm1, %v682_v10, 0.0 }
   0x7   :  { %90 = vadd.xlane.f32.xlu0 %v89_v8 }
   0xd   :  { %648 = vmatmul.msk.f32.gmra.mxu0 %vm46_vm0, %v779_v3 }
   0xf   :  { %93 = vadd.xlane.f32.xlu0 %v92_v11  ;;  %v674_v11 = vunpack.c.h.bf16 %v672_v63 }
  0x15   :  { %649 = vmatmul.msk.f32.gmra.mxu0 %vm46_vm0, %v786_v4 }
  0x1d   :  { %650 = vmatmul.msk.f32.gmra.mxu0 %vm46_vm0, %v793_v5 }
  0x7a   :  { %v91_v24 = vpop.xlane.xlu0 %90 }
  0x7b   :  { %v95_v25 = vmax.f32 %v91_v24, 1.0 }
  0x7d   :  { %698 = vrcp.f32 %v95_v25 }
  0x82   :  { %v76_v9 = vpop.f32.mrf.mxu0  ;;  %v94_v26 = vpop.xlane.xlu0 %93 }
  0x83   :  { %v77_v19 = vadd.f32 %v693_v14, %v76_v9  ;;  %v96_v27 = vmax.f32 %v94_v26, 1.0  ;;  %v699_v28 = vpop.eup %698  ;;  %v673_v9 = vunpack.c.l.bf16 %v672_v63 }
  0x84   :  { %v99_v29 = vmul.f32 %v699_v28, %v95_v25 }
  0x85   :  { %700 = vrcp.f32 %v96_v27 }
  0x86   :  { %v101_v30 = vsub.f32 2.0, %v99_v29 }
  0x88   :  { %v103_v33 = vmul.f32 %v699_v28, %v101_v30 }
  0x8a   :  { %v79_v12 = vpop.f32.mrf.mxu0 }
  0x8b   :  { %v80_v18 = vadd.f32 %v693_v14, %v79_v12  ;;  %v701_v31 = vpop.eup %700  ;;  %v683_v12 = vld [vmem:[%s1038_s1 + $0x8] sm:$0xff]  }
  0x8c   :  { %v100_v32 = vmul.f32 %v701_v31, %v96_v27 }
  0x8e   :  { %v102_v36 = vsub.f32 2.0, %v100_v32 }
  0x90   :  { %v104_v37 = vmul.f32 %v701_v31, %v102_v36 }
  0x92   :  { %v82_v13 = vpop.f32.mrf.mxu0 }
  0x93   :  { %v83_v17 = vadd.f32 %v693_v14, %v82_v13  ;;  %v677_v13 = vunpack.c.l.bf16 %v683_v12 }
  0x9a   :  { %v85_v15 = vpop.f32.mrf.mxu0 }
  0x9b   :  { %v86_v16 = vadd.f32 %v693_v14, %v85_v15  ;;  %v678_v14 = vunpack.c.h.bf16 %v683_v12 }
  0x9d   :  { %123 = vmatpush.msra.mxu2 %v86_v16 }
  0x9f   :  { %124 = vmatpush.msra.mxu2 %v83_v17 }
  0xa1   :  { %125 = vmatpush.msra.mxu2 %v80_v18 }
  0xa3   :  { %126 = vmatpush.msra.mxu2 %v77_v19 }
  0xa4   :  { %651 = vmatmul.msk.f32.vlgmr.msra.gmra.mxu2 %vm88_vm1, %v681_v7 }
  0xa5   :  { %154 = vmatpush.msrb.mxu2 %v35_v20 }
  0xa7   :  { %155 = vmatpush.msrb.mxu2 %v34_v21 }
  0xa9   :  { %156 = vmatpush.msrb.mxu2 %v33_v22 }
  0xab   :  { %157 = vmatpush.msrb.mxu2 %v32_v23 }
  0xac   :  { %652 = vmatmul.msk.f32.gmra.mxu2 %vm88_vm1, %v682_v10 }
 0x127   :  { %v128_v34 = vpop.f32.mrf.mxu2 }
 0x128   :  { %v134_v35 = vmul.f32 %v128_v34, %v103_v33 }
 0x12a   :  { %653 = vmatmul.msk.f32.vlgmr.msrb.gmra.mxu2 %vm88_vm1, %v134_v35 }
 0x12f   :  { %v131_v38 = vpop.f32.mrf.mxu2 }
 0x130   :  { %v135_v39 = vmul.f32 %v131_v38, %v104_v37 }
 0x132   :  { %654 = vmatmul.msk.f32.gmra.mxu2 %vm88_vm1, %v135_v39 }
 0x1ad   :  { %v159_v40 = vpop.f32.mrf.mxu2 }
 0x1ae   :  { %v167_v41 = vmul.f32 0.2, %v159_v40  ;;  %vm165_vm2 = vcmp.ge.f32.partialorder %v159_v40, 0.0 }
 0x1b0   :  { %v169_v43 = vsel %vm165_vm2, %v159_v40, %v167_v41 }
 0x1b1   :  { %v171_v46 = vsel %vm88_vm1, %v169_v43, -inf }
 0x1b5   :  { %v162_v42 = vpop.f32.mrf.mxu2 }
 0x1b6   :  { %vm166_vm3 = vcmp.ge.f32.partialorder %v162_v42, 0.0  ;;  %v168_v44 = vmul.f32 0.2, %v162_v42 }
 0x1b8   :  { %v170_v45 = vsel %vm166_vm3, %v162_v42, %v168_v44 }
 0x1b9   :  { %v172_v47 = vsel %vm88_vm1, %v170_v45, -inf }
 0x1ba   :  { %v173_v48 = vmax.f32 %v171_v46, %v172_v47 }
 0x1bc   :  { %v174_v49 = vrot.slane %v173_v48, 4 }
 0x1be   :  { %v175_v50 = vmax.f32 %v173_v48, %v174_v49 }
 0x1c0   :  { %v176_v51 = vrot.slane %v175_v50, 2 }
 0x1c2   :  { %v177_v52 = vmax.f32 %v175_v50, %v176_v51 }
 0x1c4   :  { %v178_v53 = vrot.slane %v177_v52, 1 }
 0x1c6   :  { %v179_v54 = vmax.f32 %v177_v52, %v178_v53 }
 0x1c8   :  { %v180_v55 = vsub.f32 %v169_v43, %v179_v54  ;;  %v181_v56 = vsub.f32 %v170_v45, %v179_v54 }
 0x1ca   :  { %v182_v57 = vmul.f32 1.442695, %v180_v55  ;;  %v184_v58 = vmul.f32 1.442695, %v181_v56 }
 0x1cc   :  { %702 = vpow2.f32 %v182_v57 }
 0x1cd   :  { %704 = vpow2.f32 %v184_v58 }
 0x1d2   :  { %v703_v59 = vpop.eup %702 }
 0x1d3   :  { %v705_v60 = vpop.eup %704  ;;  %v186_v8 = vmul.f32 %v703_v59, %v134_v35 }
 0x1d4   :  { %v688_v61 = vpack.i.bf16 %v703_v59, %v705_v60  ;;  %v187_v6 = vmul.f32 %v705_v60, %v135_v39 }
 0x1d6   :  { %689 = vrot.lane.b32.xlu1 %v688_v61, %s740_s8 }
 0x248   :  { %v690_v62 = vpop.permute.xlu1 %689 }
 0x249   :  { %v692_v0 = vunpack.i.h.bf16 %v690_v62  ;;  %v691_v1 = vunpack.i.l.bf16 %v690_v62 }
 0x24b   :  { %v197_v7 = vsel %vm88_vm1, %v187_v6, %v691_v1  ;;  %v196_v10 = vsel %vm88_vm1, %v186_v8, %v692_v0 }
 0x24c   :  { %224 = vmatpush.msra.mxu3 %v197_v7 }
 0x24e   :  { %225 = vmatpush.msra.mxu3 %v196_v10 }
 0x24f   :  { %655 = vmatmul.msk.f32.vlgmr.msra.gmra.mxu3 %vm46_vm0, %v673_v9 }
 0x257   :  { %656 = vmatmul.msk.f32.gmra.mxu3 %vm46_vm0, %v674_v11  ;;  %v742_v11 = vmov 32.0  }
 0x25f   :  { %657 = vmatmul.msk.f32.gmra.mxu3 %vm46_vm0, %v677_v13 }
 0x267   :  { %658 = vmatmul.msk.f32.gmra.mxu3 %vm46_vm0, %v678_v14 }
 0x2d2   :  { %v227_v15 = vpop.f32.mrf.mxu3 }
 0x2d3   :  { %v239_v16 = vmax.f32 %v227_v15, 1e-30 }
 0x2d5   :  { %706 = vrcp.f32 %v239_v16 }
 0x2da   :  { %v230_v17 = vpop.f32.mrf.mxu3 }
 0x2db   :  { %v707_v18 = vpop.eup %706  ;;  %v240_v19 = vmax.f32 %v230_v17, 1e-30 }
 0x2dc   :  { %v247_v20 = vmul.f32 %v707_v18, %v239_v16 }
 0x2dd   :  { %708 = vrcp.f32 %v240_v19 }
 0x2de   :  { %v251_v21 = vsub.f32 2.0, %v247_v20 }
 0x2e0   :  { %v255_v22 = vmul.f32 %v707_v18, %v251_v21 }
 0x2e2   :  { %263 = vrot.lane.b32.xlu1 %v255_v22, %s741_s13  ;;  %v233_v23 = vpop.f32.mrf.mxu3 }
 0x2e3   :  { %v709_v24 = vpop.eup %708  ;;  %v241_v25 = vmax.f32 %v233_v23, 1e-30 }
 0x2e4   :  { %v248_v26 = vmul.f32 %v709_v24, %v240_v19 }
 0x2e5   :  { %710 = vrcp.f32 %v241_v25 }
 0x2e6   :  { %v252_v27 = vsub.f32 2.0, %v248_v26 }
 0x2e8   :  { %v256_v28 = vmul.f32 %v709_v24, %v252_v27 }
 0x2ea   :  { %265 = vrot.lane.b32.xlu2 %v256_v28, %s741_s13  ;;  %v236_v29 = vpop.f32.mrf.mxu3 }
 0x2eb   :  { %v711_v30 = vpop.eup %710  ;;  %v242_v31 = vmax.f32 %v236_v29, 1e-30 }
 0x2ec   :  { %v249_v32 = vmul.f32 %v711_v30, %v241_v25 }
 0x2ed   :  { %712 = vrcp.f32 %v242_v31 }
 0x2ee   :  { %v253_v33 = vsub.f32 2.0, %v249_v32 }
 0x2f0   :  { %v257_v34 = vmul.f32 %v711_v30, %v253_v33 }
 0x2f2   :  { %267 = vrot.lane.b32.xlu2 %v257_v34, %s741_s13 }
 0x2f3   :  { %v713_v35 = vpop.eup %712 }
 0x2f4   :  { %v250_v36 = vmul.f32 %v713_v35, %v242_v31 }
 0x2f6   :  { %v254_v37 = vsub.f32 2.0, %v250_v36 }
 0x2f8   :  { %v258_v38 = vmul.f32 %v713_v35, %v254_v37 }
 0x2fa   :  { %269 = vrot.lane.b32.xlu0 %v258_v38, %s741_s13 }
 0x344   :  { %v266_v39 = vpop.permute.xlu2 %265 }
 0x345   :  { %v276_v40 = vmul.f32 %v266_v39, %v230_v17 }
 0x347   :  { %v284_v41 = vmin.f32 %v276_v40, 0.0  ;;  %vm280_vm4 = vcmp.gt.f32.partialorder %v276_v40, 0.0 }
 0x349   :  { %v289_v42 = vmul.f32 1.442695, %v284_v41 }
 0x34b   :  { %714 = vpow2.f32 %v289_v42 }
 0x34c   :  { %v268_v43 = vpop.permute.xlu2 %267 }
 0x34d   :  { %v277_v44 = vmul.f32 %v268_v43, %v233_v23 }
 0x34f   :  { %v285_v45 = vmin.f32 %v277_v44, 0.0  ;;  %vm281_vm5 = vcmp.gt.f32.partialorder %v277_v44, 0.0 }
 0x351   :  { %v715_v46 = vpop.eup %714  ;;  %v291_v47 = vmul.f32 1.442695, %v285_v45 }
 0x352   :  { %v660_v48 = vadd.f32 -1.0, %v715_v46 }
 0x353   :  { %716 = vpow2.f32 %v291_v47 }
 0x354   :  { %v264_v49 = vpop.permute.xlu1 %263  ;;  %v300_v50 = vsel %vm280_vm4, %v276_v40, %v660_v48 }
 0x355   :  { %v275_v51 = vmul.f32 %v264_v49, %v227_v15  ;;  %v306_v52 = vsel %vm88_vm1, %v300_v50, 0.0 }
 0x356   :  { %307 = vadd.xlane.f32.xlu2 %v306_v52 }
 0x357   :  { %v283_v53 = vmin.f32 %v275_v51, 0.0  ;;  %vm279_vm6 = vcmp.gt.f32.partialorder %v275_v51, 0.0 }
 0x359   :  { %v717_v54 = vpop.eup %716  ;;  %v287_v55 = vmul.f32 1.442695, %v283_v53  ;;  %v871_v53 = vld [vmem:[%s1036_s2 + $0x52] ss:$0 sm:$0xff] }
 0x35a   :  { %v661_v56 = vadd.f32 -1.0, %v717_v54 }
 0x35b   :  { %718 = vpow2.f32 %v287_v55 }
 0x35c   :  { %v301_v57 = vsel %vm281_vm5, %v277_v44, %v661_v56 }
 0x35d   :  { %v309_v58 = vsel %vm88_vm1, %v301_v57, 0.0 }
 0x35e   :  { %310 = vadd.xlane.f32.xlu0 %v309_v58 }
 0x361   :  { %v719_v59 = vpop.eup %718 }
 0x362   :  { %v659_v60 = vadd.f32 -1.0, %v719_v59 }
 0x364   :  { %v299_v61 = vsel %vm279_vm6, %v275_v51, %v659_v60 }
 0x365   :  { %v303_v62 = vsel %vm88_vm1, %v299_v61, 0.0 }
 0x366   :  { %304 = vadd.xlane.f32.xlu1 %v303_v62 }
 0x36c   :  { %v270_v63 = vpop.permute.xlu0 %269 }
 0x36d   :  { %v278_v0 = vmul.f32 %v270_v63, %v236_v29  ;;  %v39_v63 = vld [vmem:[%s1036_s2 + $0x48] sm:$0xff] }
 0x36e   :  { %608 = vmatpush.msra.mxu1 %v39_v63 }
 0x36f   :  { %v286_v1 = vmin.f32 %v278_v0, 0.0  ;;  %vm282_vm7 = vcmp.gt.f32.partialorder %v278_v0, 0.0 }
 0x371   :  { %v293_v6 = vmul.f32 1.442695, %v286_v1 }
 0x373   :  { %720 = vpow2.f32 %v293_v6 }
 0x374   :  { %722 = vrcp.f32 %v742_v11  ;;  %v36_v11 = vld [vmem:[%s1036_s2 + $0x30] sm:$0xff] }
 0x379   :  { %v721_v7 = vpop.eup %720 }
 0x37a   :  { %v662_v8 = vadd.f32 -1.0, %v721_v7  ;;  %v723_v12 = vpop.eup %722  ;;  %v37_v7 = vld [vmem:[%s1036_s2 + $0x38] sm:$0xff] }
 0x37b   :  { %v316_v13 = vmul.f32 32.0, %v723_v12  ;;  %vm320_vm8 = vweird.f32 %v723_v12 }
 0x37c   :  { %v302_v9 = vsel %vm282_vm7, %v278_v0, %v662_v8  ;;  %v38_v0 = vld [vmem:[%s1036_s2 + $0x40] sm:$0xff] }
 0x37d   :  { %v312_v10 = vsel %vm88_vm1, %v302_v9, 0.0  ;;  %v317_v14 = vsub.f32 1.0, %v316_v13  ;;  %609 = vmatpush.msra.mxu1 %v38_v0 }
 0x37e   :  { %313 = vadd.xlane.f32.xlu2 %v312_v10 }
 0x37f   :  { %v318_v15 = vmul.f32 %v723_v12, %v317_v14  ;;  %610 = vmatpush.msra.mxu1 %v37_v7 }
 0x381   :  { %v319_v16 = vadd.f32 %v723_v12, %v318_v15  ;;  %611 = vmatpush.msra.mxu1 %v36_v11 }
 0x383   :  { %v839_v17 = vsel %vm320_vm8, %v723_v12, %v319_v16 }
 0x3c9   :  { %v308_v18 = vpop.xlane.xlu2 %307 }
 0x3ca   :  { %v323_v19 = vmul.f32 %v839_v17, %v308_v18 }
 0x3cc   :  { %v327_v20 = vsub.f32 %v300_v50, %v323_v19  ;;  %v866_v50 = vld [vmem:[%s1036_s2 + $0x51] ss:$0 sm:$0xff] }
 0x3ce   :  { %v331_v21 = vmul.f32 %v327_v20, %v327_v20 }
 0x3d0   :  { %v337_v22 = vsel %vm88_vm1, %v331_v21, 0.0 }
 0x3d1   :  { %338 = vadd.xlane.f32.xlu2 %v337_v22  ;;  %v311_v23 = vpop.xlane.xlu0 %310 }
 0x3d2   :  { %v324_v26 = vmul.f32 %v839_v17, %v311_v23 }
 0x3d4   :  { %v849_v29 = vsub.f32 %v301_v57, %v324_v26 }
 0x3d6   :  { %v332_v31 = vmul.f32 %v849_v29, %v849_v29 }
 0x3d8   :  { %v340_v32 = vsel %vm88_vm1, %v332_v31, 0.0 }
 0x3d9   :  { %v305_v24 = vpop.xlane.xlu1 %304 }
 0x3da   :  { %v322_v25 = vmul.f32 %v839_v17, %v305_v24 }
 0x3dc   :  { %v845_v27 = vsub.f32 %v299_v61, %v322_v25 }
 0x3de   :  { %v330_v28 = vmul.f32 %v845_v27, %v845_v27 }
 0x3e0   :  { %v334_v30 = vsel %vm88_vm1, %v330_v28, 0.0 }
 0x3e1   :  { %335 = vadd.xlane.f32.xlu1 %v334_v30 }
 0x3e9   :  { %341 = vadd.xlane.f32.xlu1 %v340_v32 }
 0x3f1   :  { %v314_v33 = vpop.xlane.xlu2 %313 }
 0x3f2   :  { %v325_v34 = vmul.f32 %v839_v17, %v314_v33 }
 0x3f4   :  { %v856_v35 = vsub.f32 %v302_v9, %v325_v34 }
 0x3f6   :  { %v333_v36 = vmul.f32 %v856_v35, %v856_v35 }
 0x3f8   :  { %v343_v37 = vsel %vm88_vm1, %v333_v36, 0.0 }
 0x3f9   :  { %344 = vadd.xlane.f32.xlu2 %v343_v37 }
 0x444   :  { %v339_v38 = vpop.xlane.xlu2 %338 }
 0x445   :  { %v347_v39 = vmul.f32 %v339_v38, %v839_v17 }
 0x447   :  { %v351_v40 = vadd.f32 1e-06, %v347_v39 }
 0x449   :  { %724 = vrsqrt.f32 %v351_v40  ;;  %vm370_vm10 = vweird.f32 %v351_v40 }
 0x44f   :  { %v725_v41 = vpop.eup %724 }
 0x450   :  { %v365_v42 = vmul.f32 %v725_v41, %v351_v40  ;;  %vm371_vm9 = vweird.f32 %v725_v41 }
 0x451   :  { %vm372_vm11 = vmor %vm370_vm10, %vm371_vm9 }
 0x452   :  { %v366_v43 = vmul.f32 %v725_v41, %v365_v42 }
 0x454   :  { %v367_v44 = vmul.f32 0.5, %v366_v43  ;;  %v336_v45 = vpop.xlane.xlu1 %335 }
 0x455   :  { %v346_v46 = vmul.f32 %v336_v45, %v839_v17 }
 0x456   :  { %v368_v47 = vsub.f32 1.5, %v367_v44 }
 0x457   :  { %v350_v48 = vadd.f32 1e-06, %v346_v46 }
 0x458   :  { %v369_v49 = vmul.f32 %v725_v41, %v368_v47 }
 0x459   :  { %726 = vrsqrt.f32 %v350_v48  ;;  %vm360_vm13 = vweird.f32 %v350_v48 }
 0x45a   :  { %v373_v51 = vsel %vm372_vm11, %v725_v41, %v369_v49 }
 0x45b   :  { %v395_v52 = vmul.f32 %v373_v51, %v327_v20 }
 0x45c   :  { %v342_v54 = vpop.xlane.xlu1 %341 }
 0x45d   :  { %v348_v55 = vmul.f32 %v342_v54, %v839_v17  ;;  %v400_v56 = vmul.f32 %v866_v50, %v395_v52 }
 0x45f   :  { %v727_v57 = vpop.eup %726  ;;  %v352_v58 = vadd.f32 1e-06, %v348_v55  ;;  %v876_v59 = vadd.f32 %v871_v53, %v400_v56 }
 0x460   :  { %v355_v60 = vmul.f32 %v727_v57, %v350_v48  ;;  %vm361_vm12 = vweird.f32 %v727_v57 }
 0x461   :  { %728 = vrsqrt.f32 %v352_v58  ;;  %v879_v61 = vmul.f32 0.70710677, %v876_v59  ;;  %vm362_vm14 = vmor %vm360_vm13, %vm361_vm12  ;;  %vm380_vm2 = vweird.f32 %v352_v58 }
 0x462   :  { %v356_v62 = vmul.f32 %v727_v57, %v355_v60 }
 0x463   :  { %v456_v1 = vmul.f32 %v879_v61, %v879_v61 }
 0x464   :  { %v357_v6 = vmul.f32 0.5, %v356_v62 }
 0x465   :  { %v892_v8 = vmin.f32 %v456_v1, 16.0 }
 0x466   :  { %v358_v9 = vsub.f32 1.5, %v357_v6 }
 0x467   :  { %v729_v10 = vpop.eup %728  ;;  %v469_v12 = vmul.f32 3.8918573e-05, %v892_v8 }
 0x468   :  { %v359_v13 = vmul.f32 %v727_v57, %v358_v9  ;;  %v375_v14 = vmul.f32 %v729_v10, %v352_v58  ;;  %vm381_vm15 = vweird.f32 %v729_v10 }
 0x469   :  { %v470_v15 = vadd.f32 0.001143296, %v469_v12  ;;  %vm382_vm3 = vmor %vm380_vm2, %vm381_vm15 }
 0x46a   :  { %v363_v16 = vsel %vm362_vm14, %v727_v57, %v359_v13  ;;  %v376_v18 = vmul.f32 %v729_v10, %v375_v14 }
 0x46b   :  { %v394_v19 = vmul.f32 %v363_v16, %v845_v27  ;;  %v471_v20 = vmul.f32 %v470_v15, %v892_v8 }
 0x46c   :  { %v377_v21 = vmul.f32 0.5, %v376_v18  ;;  %v345_v22 = vpop.xlane.xlu2 %344 }
 0x46d   :  { %v349_v23 = vmul.f32 %v345_v22, %v839_v17  ;;  %v399_v24 = vmul.f32 %v866_v50, %v394_v19  ;;  %v472_v25 = vadd.f32 0.014752088, %v471_v20  ;;  %v458_v17 = vmul.f32 2.1237322e-06, %v892_v8 }
 0x46e   :  { %v378_v26 = vsub.f32 1.5, %v377_v21 }
 0x46f   :  { %v353_v28 = vadd.f32 1e-06, %v349_v23  ;;  %v903_v30 = vadd.f32 %v871_v53, %v399_v24  ;;  %v473_v31 = vmul.f32 %v472_v25, %v892_v8  ;;  %v459_v40 = vadd.f32 0.00028619796, %v458_v17 }
 0x470   :  { %v379_v32 = vmul.f32 %v729_v10, %v378_v26 }
 0x471   :  { %730 = vrsqrt.f32 %v353_v28  ;;  %v907_v27 = vmul.f32 0.70710677, %v903_v30  ;;  %v474_v34 = vadd.f32 0.112945676, %v473_v31  ;;  %v460_v51 = vmul.f32 %v459_v40, %v892_v8 }
 0x472   :  { %v383_v33 = vsel %vm382_vm3, %v729_v10, %v379_v32  ;;  %vm390_vm5 = vweird.f32 %v353_v28 }
 0x473   :  { %v396_v36 = vmul.f32 %v383_v33, %v849_v29  ;;  %v416_v37 = vmul.f32 %v907_v27, %v907_v27  ;;  %v475_v38 = vmul.f32 %v474_v34, %v892_v8  ;;  %v461_v63 = vadd.f32 0.0036580483, %v460_v51 }
 0x475   :  { %v914_v39 = vmin.f32 %v416_v37, 16.0  ;;  %v401_v41 = vmul.f32 %v866_v50, %v396_v36  ;;  %v476_v42 = vadd.f32 0.4994258, %v475_v38  ;;  %v462_v12 = vmul.f32 %v461_v63, %v892_v8 }
 0x477   :  { %v731_v43 = vpop.eup %730  ;;  %v418_v44 = vmul.f32 2.1237322e-06, %v914_v39  ;;  %v429_v45 = vmul.f32 3.8918573e-05, %v914_v39  ;;  %v920_v46 = vadd.f32 %v871_v53, %v401_v41  ;;  %v477_v47 = vmul.f32 %v476_v42, %v892_v8 }
 0x478   :  { %v385_v29 = vmul.f32 %v731_v43, %v353_v28  ;;  %vm391_vm4 = vweird.f32 %v731_v43  ;;  %v463_v24 = vadd.f32 0.05243302, %v462_v12 }
 0x479   :  { %v419_v48 = vadd.f32 0.00028619796, %v418_v44  ;;  %v430_v49 = vadd.f32 0.001143296, %v429_v45  ;;  %v924_v54 = vadd.f32 1.0, %v477_v47  ;;  %vm392_vm6 = vmor %vm390_vm5, %vm391_vm4 }
 0x47a   :  { %v386_v52 = vmul.f32 %v731_v43, %v385_v29  ;;  %v927_v55 = vmul.f32 0.70710677, %v920_v46  ;;  %v464_v37 = vmul.f32 %v463_v24, %v892_v8 }
 0x47b   :  { %v420_v56 = vmul.f32 %v419_v48, %v914_v39  ;;  %v431_v57 = vmul.f32 %v430_v49, %v914_v39  ;;  %732 = vrcp.f32 %v924_v54  ;;  %vm484_vm7 = vweird.f32 %v924_v54 }
 0x47c   :  { %v387_v58 = vmul.f32 0.5, %v386_v52  ;;  %v496_v0 = vmul.f32 %v927_v55, %v927_v55 }
 0x47d   :  { %v421_v60 = vadd.f32 0.0036580483, %v420_v56  ;;  %v432_v62 = vadd.f32 0.014752088, %v431_v57 }
 0x47e   :  { %v388_v1 = vsub.f32 1.5, %v387_v58  ;;  %v935_v7 = vmin.f32 %v496_v0, 16.0 }
 0x47f   :  { %v433_v6 = vmul.f32 %v432_v62, %v914_v39  ;;  %v422_v10 = vmul.f32 %v421_v60, %v914_v39  ;;  %v490_v62 = vand.u32 2147483648, %v924_v54 }
 0x480   :  { %v389_v9 = vmul.f32 %v731_v43, %v388_v1  ;;  %v498_v13 = vmul.f32 2.1237322e-06, %v935_v7  ;;  %v509_v15 = vmul.f32 3.8918573e-05, %v935_v7 }
 0x481   :  { %v434_v11 = vadd.f32 0.112945676, %v433_v6  ;;  %v943_v19 = vpop.eup %732  ;;  %v423_v20 = vadd.f32 0.05243302, %v422_v10 }
 0x482   :  { %v393_v14 = vsel %vm392_vm6, %v731_v43, %v389_v9  ;;  %v499_v21 = vadd.f32 0.00028619796, %v498_v13  ;;  %v510_v22 = vadd.f32 0.001143296, %v509_v15  ;;  %vm485_vm8 = vweird.f32 %v943_v19 }
 0x483   :  { %v397_v16 = vmul.f32 %v393_v14, %v856_v35  ;;  %v435_v18 = vmul.f32 %v434_v11, %v914_v39  ;;  %v480_v35 = vmul.f32 %v943_v19, %v924_v54  ;;  %v424_v17 = vmul.f32 %v423_v20, %v914_v39  ;;  %vm984_vm10 = vmor %vm484_vm7, %vm485_vm8 }
 0x484   :  { %v500_v26 = vmul.f32 %v499_v21, %v935_v7  ;;  %v511_v28 = vmul.f32 %v510_v22, %v935_v7  ;;  %v491_v22 = vor.u32 1.1754944e-38, %v490_v62 }
 0x485   :  { %v436_v23 = vadd.f32 0.4994258, %v435_v18  ;;  %v402_v25 = vmul.f32 %v866_v50, %v397_v16  ;;  %v481_v40 = vsub.f32 1.0, %v480_v35  ;;  %v425_v41 = vadd.f32 0.18741608, %v424_v17 }
 0x486   :  { %v501_v33 = vadd.f32 0.0036580483, %v500_v26  ;;  %v512_v34 = vadd.f32 0.014752088, %v511_v28 }
 0x487   :  { %v437_v31 = vmul.f32 %v436_v23, %v914_v39  ;;  %v952_v32 = vadd.f32 %v871_v53, %v402_v25  ;;  %v465_v53 = vadd.f32 0.18741608, %v464_v37  ;;  %v482_v29 = vmul.f32 %v943_v19, %v481_v40 }
 0x488   :  { %v513_v50 = vmul.f32 %v512_v34, %v935_v7  ;;  %v502_v42 = vmul.f32 %v501_v33, %v935_v7  ;;  %v426_v48 = vmul.f32 %v425_v41, %v914_v39 }
 0x489   :  { %v438_v36 = vadd.f32 1.0, %v437_v31  ;;  %v958_v38 = vmul.f32 0.70710677, %v952_v32  ;;  %v466_v56 = vmul.f32 %v465_v53, %v892_v8  ;;  %v483_v63 = vadd.f32 %v943_v19, %v482_v29 }
 0x48a   :  { %v514_v43 = vadd.f32 0.112945676, %v513_v50  ;;  %v503_v49 = vadd.f32 0.05243302, %v502_v42  ;;  %v427_v6 = vadd.f32 1.1283791, %v426_v48 }
 0x48b   :  { %734 = vrcp.f32 %v438_v36  ;;  %v536_v44 = vmul.f32 %v958_v38, %v958_v38  ;;  %v488_v8 = vand.u32 2147483647, %v924_v54  ;;  %v450_v11 = vand.u32 2147483648, %v438_v36 }
 0x48c   :  { %v515_v45 = vmul.f32 %v514_v43, %v935_v7  ;;  %v504_v10 = vmul.f32 %v503_v49, %v935_v7  ;;  %v448_v16 = vand.u32 2147483647, %v438_v36  ;;  %v467_v20 = vadd.f32 1.1283791, %v466_v56 }
 0x48d   :  { %v965_v47 = vmin.f32 %v536_v44, 16.0  ;;  %v487_v21 = vsel %vm984_vm10, %v943_v19, %v483_v63  ;;  %vm444_vm11 = vweird.f32 %v438_v36  ;;  %v428_v26 = vmul.f32 %v427_v6, %v907_v27 }
 0x48e   :  { %v516_v51 = vadd.f32 0.4994258, %v515_v45  ;;  %v505_v24 = vadd.f32 0.18741608, %v504_v10  ;;  %v451_v28 = vor.u32 1.1754944e-38, %v450_v11  ;;  %vm489_vm13 = vcmp.eq.f32.partialorder %v488_v8, 8.507059e+37 }
 0x48f   :  { %v538_v57 = vmul.f32 2.1237322e-06, %v965_v47  ;;  %v549_v58 = vmul.f32 3.8918573e-05, %v965_v47  ;;  %vm449_vm14 = vcmp.eq.f32.partialorder %v448_v16, 8.507059e+37  ;;  %v492_v35 = vsel %vm489_vm13, %v491_v22, %v487_v21 }
 0x490   :  { %v517_v39 = vmul.f32 %v516_v51, %v935_v7  ;;  %v468_v19 = vmul.f32 %v467_v20, %v879_v61  ;;  %v506_v37 = vmul.f32 %v505_v24, %v935_v7  ;;  %v408_v53 = vmul.f32 0.5, %v903_v30 }
 0x491   :  { %v735_v52 = vpop.eup %734  ;;  %v539_v0 = vadd.f32 0.00028619796, %v538_v57  ;;  %v550_v1 = vadd.f32 0.001143296, %v549_v58  ;;  %v409_v6 = vmul.f32 0.5, %v876_v59  ;;  %v410_v16 = vmul.f32 0.5, %v920_v46 }
 0x492   :  { %v440_v60 = vmul.f32 %v735_v52, %v438_v36  ;;  %v518_v12 = vadd.f32 1.0, %v517_v39  ;;  %vm445_vm9 = vweird.f32 %v735_v52  ;;  %v493_v40 = vmul.f32 %v492_v35, %v468_v19 }
 0x493   :  { %v540_v13 = vmul.f32 %v539_v0, %v965_v47  ;;  %v551_v14 = vmul.f32 %v550_v1, %v965_v47  ;;  %vm446_vm12 = vmor %vm444_vm11, %vm445_vm9  ;;  %v507_v45 = vadd.f32 1.1283791, %v506_v37 }
 0x494   :  { %v441_v9 = vsub.f32 1.0, %v440_v60  ;;  %736 = vrcp.f32 %v518_v12  ;;  %v664_v48 = vclamps-f32 %v493_v40, 1.0  ;;  %v530_v49 = vand.u32 2147483648, %v518_v12 }
 0x495   :  { %v552_v25 = vadd.f32 0.014752088, %v551_v14  ;;  %v541_v54 = vadd.f32 0.0036580483, %v540_v13  ;;  %v528_v56 = vand.u32 2147483647, %v518_v12  ;;  %vm524_vm2 = vweird.f32 %v518_v12 }
 0x496   :  { %v442_v15 = vmul.f32 %v735_v52, %v441_v9  ;;  %v531_v60 = vor.u32 1.1754944e-38, %v530_v49  ;;  %v577_v63 = vadd.f32 1.0, %v664_v48  ;;  %v508_v39 = vmul.f32 %v507_v45, %v927_v55 }
 0x497   :  { %v553_v17 = vmul.f32 %v552_v25, %v965_v47  ;;  %v542_v27 = vmul.f32 %v541_v54, %v965_v47  ;;  %vm529_vm4 = vcmp.eq.f32.partialorder %v528_v56, 8.507059e+37  ;;  %v411_v54 = vmul.f32 0.5, %v952_v32 }
 0x498   :  { %v443_v23 = vadd.f32 %v735_v52, %v442_v15  ;;  %v581_v10 = vmul.f32 %v577_v63, %v409_v6 }
 0x499   :  { %v554_v36 = vadd.f32 0.112945676, %v553_v17  ;;  %v543_v61 = vadd.f32 0.05243302, %v542_v27  ;;  %v696_v17 = vld [vmem:[%s1036_s2 + $0x53] ss:$0 sm:$0xff] }
 0x49a   :  { %v447_v31 = vsel %vm446_vm12, %v735_v52, %v443_v23  ;;  %v737_v50 = vpop.eup %736 }
 0x49b   :  { %v452_v33 = vsel %vm449_vm14, %v451_v28, %v447_v31  ;;  %v520_v42 = vmul.f32 %v737_v50, %v518_v12  ;;  %v555_v43 = vmul.f32 %v554_v36, %v965_v47  ;;  %vm525_vm15 = vweird.f32 %v737_v50 }
 0x49c   :  { %v453_v34 = vmul.f32 %v452_v33, %v428_v26  ;;  %vm526_vm3 = vmor %vm524_vm2, %vm525_vm15  ;;  %v544_v30 = vmul.f32 %v543_v61, %v965_v47  ;;  %v697_v33 = vld [vmem:[%s1036_s2 + $0x54] ss:$0 sm:$0xff] }
 0x49d   :  { %v521_v29 = vsub.f32 1.0, %v520_v42  ;;  %v556_v51 = vadd.f32 0.4994258, %v555_v43 }
 0x49e   :  { %v663_v41 = vclamps-f32 %v453_v34, 1.0  ;;  %v545_v8 = vadd.f32 0.18741608, %v544_v30 }
 0x49f   :  { %v522_v7 = vmul.f32 %v737_v50, %v521_v29  ;;  %v557_v57 = vmul.f32 %v556_v51, %v965_v47 }
 0x4a0   :  { %v576_v44 = vadd.f32 1.0, %v663_v41  ;;  %v546_v13 = vmul.f32 %v545_v8, %v965_v47 }
 0x4a1   :  { %v523_v58 = vadd.f32 %v737_v50, %v522_v7  ;;  %v558_v62 = vadd.f32 1.0, %v557_v57 }
 0x4a2   :  { %v580_v52 = vmul.f32 %v576_v44, %v408_v53  ;;  %v547_v18 = vadd.f32 1.1283791, %v546_v13 }
 0x4a3   :  { %v527_v0 = vsel %vm526_vm3, %v737_v50, %v523_v58  ;;  %738 = vrcp.f32 %v558_v62  ;;  %v570_v20 = vand.u32 2147483648, %v558_v62  ;;  %v568_v59 = vand.u32 2147483647, %v558_v62 }
 0x4a4   :  { %667 = vmatmul.msk.f32.vlgmr.msra.gmra.mxu1 %vm88_vm1, %v580_v52  ;;  %v532_v1 = vsel %vm529_vm4, %v531_v60, %v527_v0  ;;  %vm564_vm6 = vweird.f32 %v558_v62  ;;  %v548_v25 = vmul.f32 %v547_v18, %v958_v38 }
 0x4a5   :  { %v533_v9 = vmul.f32 %v532_v1, %v508_v39  ;;  %v571_v24 = vor.u32 1.1754944e-38, %v570_v20  ;;  %vm569_vm8 = vcmp.eq.f32.partialorder %v568_v59, 8.507059e+37 }
 0x4a7   :  { %v665_v11 = vclamps-f32 %v533_v9, 1.0 }
 0x4a9   :  { %v739_v12 = vpop.eup %738  ;;  %v578_v14 = vadd.f32 1.0, %v665_v11 }
 0x4aa   :  { %v560_v15 = vmul.f32 %v739_v12, %v558_v62  ;;  %vm565_vm5 = vweird.f32 %v739_v12 }
 0x4ab   :  { %v582_v21 = vmul.f32 %v578_v14, %v410_v16  ;;  %vm566_vm7 = vmor %vm564_vm6, %vm565_vm5 }
 0x4ac   :  { %668 = vmatmul.msk.f32.gmra.mxu1 %vm88_vm1, %v581_v10  ;;  %v561_v55 = vsub.f32 1.0, %v560_v15 }
 0x4ae   :  { %v562_v22 = vmul.f32 %v739_v12, %v561_v55 }
 0x4b0   :  { %v563_v23 = vadd.f32 %v739_v12, %v562_v22 }
 0x4b2   :  { %v567_v47 = vsel %vm566_vm7, %v739_v12, %v563_v23 }
 0x4b3   :  { %v572_v26 = vsel %vm569_vm8, %v571_v24, %v567_v47 }
 0x4b4   :  { %669 = vmatmul.msk.f32.gmra.mxu1 %vm88_vm1, %v582_v21  ;;  %v573_v28 = vmul.f32 %v572_v26, %v548_v25 }
 0x4b6   :  { %v666_v46 = vclamps-f32 %v573_v28, 1.0 }
 0x4b8   :  { %v579_v31 = vadd.f32 1.0, %v666_v46 }
 0x4ba   :  { %v583_v35 = vmul.f32 %v579_v31, %v411_v54 }
 0x4bc   :  { %670 = vmatmul.msk.f32.gmra.mxu1 %vm88_vm1, %v583_v35 }
 0x521   :  { %v613_v38 = vpop.f32.mrf.mxu1 }
 0x522   :  { %v626_v19 = vadd.f32 %v696_v17, %v613_v38 }
 0x524   :  { %v631_v34 = vmul.f32 %v697_v33, %v626_v19 }
 0x526   :  { %v635_v37 = vadd.f32 %v631_v34, %v772_v2 }
 0x528   :  { %639 = vst.msk [vmem:[%s1039_s3] sm:$0xff] %vm46_vm0, %v635_v37 }
 0x529   :  { %v616_v32 = vpop.f32.mrf.mxu1 }
 0x52a   :  { %v627_v36 = vadd.f32 %v696_v17, %v616_v32 }
 0x52c   :  { %v632_v50 = vmul.f32 %v697_v33, %v627_v36 }
 0x52e   :  { %v636_v40 = vadd.f32 %v632_v50, %v779_v3 }
 0x530   :  { %640 = vst.msk [vmem:[%s1039_s3 + $0x8] sm:$0xff] %vm46_vm0, %v636_v40 }
 0x531   :  { %v619_v27 = vpop.f32.mrf.mxu1 }
 0x532   :  { %v628_v41 = vadd.f32 %v696_v17, %v619_v27 }
 0x534   :  { %v633_v42 = vmul.f32 %v697_v33, %v628_v41 }
 0x536   :  { %v637_v2 = vadd.f32 %v633_v42, %v786_v4 }
 0x538   :  { %641 = vst.msk [vmem:[%s1039_s3 + $0x10] sm:$0xff] %vm46_vm0, %v637_v2 }
 0x539   :  { %v622_v43 = vpop.f32.mrf.mxu1 }
 0x53a   :  { %v629_v53 = vadd.f32 %v696_v17, %v622_v43 }
 0x53c   :  { %v634_v44 = vmul.f32 %v697_v33, %v629_v53 }
 0x53e   :  { %v638_v3 = vadd.f32 %v634_v44, %v793_v5 }
 0x540   :  { %642 = vst.msk [vmem:[%s1039_s3 + $0x18] sm:$0xff] %vm46_vm0, %v638_v3 }

</bundles_post_ra>
